<compile_context>
chip_gen: v6e
topology: v6e:2x2x1
jax: 0.10.0
libtpu: 0.0.40
codegen_flags: <defaults>
</compile_context>

<pallas_src>
import jax
import jax.numpy as jnp
from jax.experimental import pallas as pl
from jax.experimental.pallas import tpu as pltpu

# ---- model spec (matches SimpleNet_43432) -----------------------------------
LAYER_DIMS = (
    (4, 3, True),   # fc1 + ReLU
    (3, 4, True),   # fc2 + ReLU
    (4, 3, True),   # fc3 + ReLU
    (3, 2, False),  # fc4 (no activation)
)
NUM_LAYERS = len(LAYER_DIMS)
IN_FEATURES = LAYER_DIMS[0][0]       # 4
OUT_FEATURES = LAYER_DIMS[-1][1]     # 2

# ---- kernel tiling constants -------------------------------------------------
F_PAD = 8          # feature rows padded to one sublane tile
TB = 512           # batch lanes per grid step (multiple of 128)
W_SLOT = 16        # 4x4 zero-padded weight slot per layer in the packed array


def _mlp_kernel(w_ref, x_ref, o_ref):
    """w_ref: SMEM f32[NUM_LAYERS*W_SLOT]  packed weights, w[li*16 + k*4 + j]
       x_ref: VMEM f32[F_PAD, TB]          features on sublanes, batch on lanes
       o_ref: VMEM f32[F_PAD, TB]
    """
    # current activation rows, each [1, TB] (batch lane-dense)
    h_rows = [x_ref[k:k + 1, :] for k in range(IN_FEATURES)]

    for li, (k_in, n_out, relu) in enumerate(LAYER_DIMS):
        base = li * W_SLOT
        new_rows = []
        for j in range(n_out):
            acc = w_ref[base + j] * h_rows[0]
            for k in range(1, k_in):
                acc = acc + w_ref[base + k * 4 + j] * h_rows[k]
            if relu:
                acc = jnp.maximum(acc, 0.0)
            new_rows.append(acc)
        h_rows = new_rows

    # lane-dense writeback: zero the tile, then store the valid feature rows.
    o_ref[...] = jnp.zeros(o_ref.shape, o_ref.dtype)
    for j, row in enumerate(h_rows):
        o_ref[j:j + 1, :] = row


def pack_weights(weights):
    """Pack per-layer [in, out] weights into one flat f32[NUM_LAYERS*16] array.
    Call ONCE at init; do NOT re-pack per forward call."""
    blocks = []
    for w in weights:
        blk = jnp.zeros((4, 4), jnp.float32).at[: w.shape[0], : w.shape[1]].set(w)
        blocks.append(blk.reshape(-1))
    return jnp.concatenate(blocks)


@jax.jit
def simplenet_forward(x, w_packed):
    """x: [B, 4] float32; w_packed: f32[NUM_LAYERS*16] from pack_weights()."""
    B = x.shape[0]
    num_tiles = pl.cdiv(B, TB)
    Bp = num_tiles * TB

    # transposed, zero-padded activations: [8 feature rows, Bp batch lanes]
    x_t = jnp.zeros((F_PAD, Bp), jnp.float32).at[:IN_FEATURES, :B].set(x.T)

    out_t = pl.pallas_call(
        _mlp_kernel,
        out_shape=jax.ShapeDtypeStruct((F_PAD, Bp), jnp.float32),
        grid=(num_tiles,),
        in_specs=[
            pl.BlockSpec(memory_space=pltpu.MemorySpace.SMEM),   # packed weights
            pl.BlockSpec((F_PAD, TB), lambda i: (0, i)),         # activation tile
        ],
        out_specs=pl.BlockSpec((F_PAD, TB), lambda i: (0, i)),
        compiler_params=pltpu.CompilerParams(
            dimension_semantics=("parallel",),
            vmem_limit_bytes=4 << 20,
        ),
    )(w_packed, x_t)

    return out_t[:OUT_FEATURES, :B].T


def init_weights(key):
    """Kaiming-uniform-style init (like nn.Linear default), stored [in, out]."""
    weights = []
    for (fan_in, fan_out, _relu) in LAYER_DIMS:
        key, sub = jax.random.split(key)
        bound = 1.0 / jnp.sqrt(jnp.float32(fan_in))
        w = jax.random.uniform(sub, (fan_in, fan_out), jnp.float32,
                               minval=-bound, maxval=bound)
        weights.append(w)
    return weights


def _reference_forward(x, weights):
    """Pure-JAX reference of the PyTorch forward."""
    h = x
    for (_, _, relu), w in zip(LAYER_DIMS, weights):
        h = h @ w
        if relu:
            h = jnp.maximum(h, 0.0)
    return h


if __name__ == "__main__":
    key = jax.random.PRNGKey(0)
    k_x, k_w = jax.random.split(key)

    B = 8
    x = jax.random.normal(k_x, (B, IN_FEATURES), jnp.float32)
    weights = init_weights(k_w)
    w_packed = pack_weights(weights)       # packed once, reused every call

    out = simplenet_forward(x, w_packed)
    out = jax.block_until_ready(out)

    ref = _reference_forward(x, weights)
    assert out.shape == (B, OUT_FEATURES), out.shape
    assert jnp.allclose(out, ref, atol=1e-5, rtol=1e-5), (
        "mismatch vs reference", out, ref
    )
    print("KERNEL_OK")
</pallas_src>

<mosaic_0001>
module attributes {stable_mosaic.version = 11 : i64} {
  func.func @_mlp_kernel(%arg0: i32, %arg1: memref<64xf32, #tpu.memory_space<smem>>, %arg2: memref<8x512xf32, #tpu.memory_space<vmem>>, %arg3: memref<8x512xf32, #tpu.memory_space<vmem>>) attributes {dimension_semantics = [#tpu.dimension_semantics<parallel>], iteration_bounds = array<i64: 1>, scalar_prefetch = 0 : i64, scratch_operands = 0 : i64, tpu.core_type = #tpu.core_type<tc>, window_params = [{transform_indices = @transform_0, window_bounds = array<i64: 64>}, {transform_indices = @transform_1, window_bounds = array<i64: 8, 512>}, {transform_indices = @transform_2, window_bounds = array<i64: 8, 512>}]} {
    %c0 = arith.constant 0 : index
    %c0_0 = arith.constant 0 : index
    %0 = vector.load %arg2[%c0, %c0_0] : memref<8x512xf32, #tpu.memory_space<vmem>>, vector<1x512xf32>
    %c1 = arith.constant 1 : index
    %c0_1 = arith.constant 0 : index
    %1 = vector.load %arg2[%c1, %c0_1] : memref<8x512xf32, #tpu.memory_space<vmem>>, vector<1x512xf32>
    %c2 = arith.constant 2 : index
    %c0_2 = arith.constant 0 : index
    %2 = vector.load %arg2[%c2, %c0_2] : memref<8x512xf32, #tpu.memory_space<vmem>>, vector<1x512xf32>
    %c3 = arith.constant 3 : index
    %c0_3 = arith.constant 0 : index
    %3 = vector.load %arg2[%c3, %c0_3] : memref<8x512xf32, #tpu.memory_space<vmem>>, vector<1x512xf32>
    %c0_4 = arith.constant 0 : index
    %4 = memref.load %arg1[%c0_4] : memref<64xf32, #tpu.memory_space<smem>>
    %5 = vector.broadcast %4 : f32 to vector<1x512xf32>
    %6 = arith.mulf %5, %0 : vector<1x512xf32>
    %c4 = arith.constant 4 : index
    %7 = memref.load %arg1[%c4] : memref<64xf32, #tpu.memory_space<smem>>
    %8 = vector.broadcast %7 : f32 to vector<1x512xf32>
    %9 = arith.mulf %8, %1 : vector<1x512xf32>
    %10 = arith.addf %6, %9 : vector<1x512xf32>
    %c8 = arith.constant 8 : index
    %11 = memref.load %arg1[%c8] : memref<64xf32, #tpu.memory_space<smem>>
    %12 = vector.broadcast %11 : f32 to vector<1x512xf32>
    %13 = arith.mulf %12, %2 : vector<1x512xf32>
    %14 = arith.addf %10, %13 : vector<1x512xf32>
    %c12 = arith.constant 12 : index
    %15 = memref.load %arg1[%c12] : memref<64xf32, #tpu.memory_space<smem>>
    %16 = vector.broadcast %15 : f32 to vector<1x512xf32>
    %17 = arith.mulf %16, %3 : vector<1x512xf32>
    %18 = arith.addf %14, %17 : vector<1x512xf32>
    %cst = arith.constant 0.000000e+00 : f32
    %19 = vector.broadcast %cst : f32 to vector<1x512xf32>
    %20 = arith.maximumf %18, %19 : vector<1x512xf32>
    %c1_5 = arith.constant 1 : index
    %21 = memref.load %arg1[%c1_5] : memref<64xf32, #tpu.memory_space<smem>>
    %22 = vector.broadcast %21 : f32 to vector<1x512xf32>
    %23 = arith.mulf %22, %0 : vector<1x512xf32>
    %c5 = arith.constant 5 : index
    %24 = memref.load %arg1[%c5] : memref<64xf32, #tpu.memory_space<smem>>
    %25 = vector.broadcast %24 : f32 to vector<1x512xf32>
    %26 = arith.mulf %25, %1 : vector<1x512xf32>
    %27 = arith.addf %23, %26 : vector<1x512xf32>
    %c9 = arith.constant 9 : index
    %28 = memref.load %arg1[%c9] : memref<64xf32, #tpu.memory_space<smem>>
    %29 = vector.broadcast %28 : f32 to vector<1x512xf32>
    %30 = arith.mulf %29, %2 : vector<1x512xf32>
    %31 = arith.addf %27, %30 : vector<1x512xf32>
    %c13 = arith.constant 13 : index
    %32 = memref.load %arg1[%c13] : memref<64xf32, #tpu.memory_space<smem>>
    %33 = vector.broadcast %32 : f32 to vector<1x512xf32>
    %34 = arith.mulf %33, %3 : vector<1x512xf32>
    %35 = arith.addf %31, %34 : vector<1x512xf32>
    %cst_6 = arith.constant 0.000000e+00 : f32
    %36 = vector.broadcast %cst_6 : f32 to vector<1x512xf32>
    %37 = arith.maximumf %35, %36 : vector<1x512xf32>
    %c2_7 = arith.constant 2 : index
    %38 = memref.load %arg1[%c2_7] : memref<64xf32, #tpu.memory_space<smem>>
    %39 = vector.broadcast %38 : f32 to vector<1x512xf32>
    %40 = arith.mulf %39, %0 : vector<1x512xf32>
    %c6 = arith.constant 6 : index
    %41 = memref.load %arg1[%c6] : memref<64xf32, #tpu.memory_space<smem>>
    %42 = vector.broadcast %41 : f32 to vector<1x512xf32>
    %43 = arith.mulf %42, %1 : vector<1x512xf32>
    %44 = arith.addf %40, %43 : vector<1x512xf32>
    %c10 = arith.constant 10 : index
    %45 = memref.load %arg1[%c10] : memref<64xf32, #tpu.memory_space<smem>>
    %46 = vector.broadcast %45 : f32 to vector<1x512xf32>
    %47 = arith.mulf %46, %2 : vector<1x512xf32>
    %48 = arith.addf %44, %47 : vector<1x512xf32>
    %c14 = arith.constant 14 : index
    %49 = memref.load %arg1[%c14] : memref<64xf32, #tpu.memory_space<smem>>
    %50 = vector.broadcast %49 : f32 to vector<1x512xf32>
    %51 = arith.mulf %50, %3 : vector<1x512xf32>
    %52 = arith.addf %48, %51 : vector<1x512xf32>
    %cst_8 = arith.constant 0.000000e+00 : f32
    %53 = vector.broadcast %cst_8 : f32 to vector<1x512xf32>
    %54 = arith.maximumf %52, %53 : vector<1x512xf32>
    %c16 = arith.constant 16 : index
    %55 = memref.load %arg1[%c16] : memref<64xf32, #tpu.memory_space<smem>>
    %56 = vector.broadcast %55 : f32 to vector<1x512xf32>
    %57 = arith.mulf %56, %20 : vector<1x512xf32>
    %c20 = arith.constant 20 : index
    %58 = memref.load %arg1[%c20] : memref<64xf32, #tpu.memory_space<smem>>
    %59 = vector.broadcast %58 : f32 to vector<1x512xf32>
    %60 = arith.mulf %59, %37 : vector<1x512xf32>
    %61 = arith.addf %57, %60 : vector<1x512xf32>
    %c24 = arith.constant 24 : index
    %62 = memref.load %arg1[%c24] : memref<64xf32, #tpu.memory_space<smem>>
    %63 = vector.broadcast %62 : f32 to vector<1x512xf32>
    %64 = arith.mulf %63, %54 : vector<1x512xf32>
    %65 = arith.addf %61, %64 : vector<1x512xf32>
    %cst_9 = arith.constant 0.000000e+00 : f32
    %66 = vector.broadcast %cst_9 : f32 to vector<1x512xf32>
    %67 = arith.maximumf %65, %66 : vector<1x512xf32>
    %c17 = arith.constant 17 : index
    %68 = memref.load %arg1[%c17] : memref<64xf32, #tpu.memory_space<smem>>
    %69 = vector.broadcast %68 : f32 to vector<1x512xf32>
    %70 = arith.mulf %69, %20 : vector<1x512xf32>
    %c21 = arith.constant 21 : index
    %71 = memref.load %arg1[%c21] : memref<64xf32, #tpu.memory_space<smem>>
    %72 = vector.broadcast %71 : f32 to vector<1x512xf32>
    %73 = arith.mulf %72, %37 : vector<1x512xf32>
    %74 = arith.addf %70, %73 : vector<1x512xf32>
    %c25 = arith.constant 25 : index
    %75 = memref.load %arg1[%c25] : memref<64xf32, #tpu.memory_space<smem>>
    %76 = vector.broadcast %75 : f32 to vector<1x512xf32>
    %77 = arith.mulf %76, %54 : vector<1x512xf32>
    %78 = arith.addf %74, %77 : vector<1x512xf32>
    %cst_10 = arith.constant 0.000000e+00 : f32
    %79 = vector.broadcast %cst_10 : f32 to vector<1x512xf32>
    %80 = arith.maximumf %78, %79 : vector<1x512xf32>
    %c18 = arith.constant 18 : index
    %81 = memref.load %arg1[%c18] : memref<64xf32, #tpu.memory_space<smem>>
    %82 = vector.broadcast %81 : f32 to vector<1x512xf32>
    %83 = arith.mulf %82, %20 : vector<1x512xf32>
    %c22 = arith.constant 22 : index
    %84 = memref.load %arg1[%c22] : memref<64xf32, #tpu.memory_space<smem>>
    %85 = vector.broadcast %84 : f32 to vector<1x512xf32>
    %86 = arith.mulf %85, %37 : vector<1x512xf32>
    %87 = arith.addf %83, %86 : vector<1x512xf32>
    %c26 = arith.constant 26 : index
    %88 = memref.load %arg1[%c26] : memref<64xf32, #tpu.memory_space<smem>>
    %89 = vector.broadcast %88 : f32 to vector<1x512xf32>
    %90 = arith.mulf %89, %54 : vector<1x512xf32>
    %91 = arith.addf %87, %90 : vector<1x512xf32>
    %cst_11 = arith.constant 0.000000e+00 : f32
    %92 = vector.broadcast %cst_11 : f32 to vector<1x512xf32>
    %93 = arith.maximumf %91, %92 : vector<1x512xf32>
    %c19 = arith.constant 19 : index
    %94 = memref.load %arg1[%c19] : memref<64xf32, #tpu.memory_space<smem>>
    %95 = vector.broadcast %94 : f32 to vector<1x512xf32>
    %96 = arith.mulf %95, %20 : vector<1x512xf32>
    %c23 = arith.constant 23 : index
    %97 = memref.load %arg1[%c23] : memref<64xf32, #tpu.memory_space<smem>>
    %98 = vector.broadcast %97 : f32 to vector<1x512xf32>
    %99 = arith.mulf %98, %37 : vector<1x512xf32>
    %100 = arith.addf %96, %99 : vector<1x512xf32>
    %c27 = arith.constant 27 : index
    %101 = memref.load %arg1[%c27] : memref<64xf32, #tpu.memory_space<smem>>
    %102 = vector.broadcast %101 : f32 to vector<1x512xf32>
    %103 = arith.mulf %102, %54 : vector<1x512xf32>
    %104 = arith.addf %100, %103 : vector<1x512xf32>
    %cst_12 = arith.constant 0.000000e+00 : f32
    %105 = vector.broadcast %cst_12 : f32 to vector<1x512xf32>
    %106 = arith.maximumf %104, %105 : vector<1x512xf32>
    %c32 = arith.constant 32 : index
    %107 = memref.load %arg1[%c32] : memref<64xf32, #tpu.memory_space<smem>>
    %108 = vector.broadcast %107 : f32 to vector<1x512xf32>
    %109 = arith.mulf %108, %67 : vector<1x512xf32>
    %c36 = arith.constant 36 : index
    %110 = memref.load %arg1[%c36] : memref<64xf32, #tpu.memory_space<smem>>
    %111 = vector.broadcast %110 : f32 to vector<1x512xf32>
    %112 = arith.mulf %111, %80 : vector<1x512xf32>
    %113 = arith.addf %109, %112 : vector<1x512xf32>
    %c40 = arith.constant 40 : index
    %114 = memref.load %arg1[%c40] : memref<64xf32, #tpu.memory_space<smem>>
    %115 = vector.broadcast %114 : f32 to vector<1x512xf32>
    %116 = arith.mulf %115, %93 : vector<1x512xf32>
    %117 = arith.addf %113, %116 : vector<1x512xf32>
    %c44 = arith.constant 44 : index
    %118 = memref.load %arg1[%c44] : memref<64xf32, #tpu.memory_space<smem>>
    %119 = vector.broadcast %118 : f32 to vector<1x512xf32>
    %120 = arith.mulf %119, %106 : vector<1x512xf32>
    %121 = arith.addf %117, %120 : vector<1x512xf32>
    %cst_13 = arith.constant 0.000000e+00 : f32
    %122 = vector.broadcast %cst_13 : f32 to vector<1x512xf32>
    %123 = arith.maximumf %121, %122 : vector<1x512xf32>
    %c33 = arith.constant 33 : index
    %124 = memref.load %arg1[%c33] : memref<64xf32, #tpu.memory_space<smem>>
    %125 = vector.broadcast %124 : f32 to vector<1x512xf32>
    %126 = arith.mulf %125, %67 : vector<1x512xf32>
    %c37 = arith.constant 37 : index
    %127 = memref.load %arg1[%c37] : memref<64xf32, #tpu.memory_space<smem>>
    %128 = vector.broadcast %127 : f32 to vector<1x512xf32>
    %129 = arith.mulf %128, %80 : vector<1x512xf32>
    %130 = arith.addf %126, %129 : vector<1x512xf32>
    %c41 = arith.constant 41 : index
    %131 = memref.load %arg1[%c41] : memref<64xf32, #tpu.memory_space<smem>>
    %132 = vector.broadcast %131 : f32 to vector<1x512xf32>
    %133 = arith.mulf %132, %93 : vector<1x512xf32>
    %134 = arith.addf %130, %133 : vector<1x512xf32>
    %c45 = arith.constant 45 : index
    %135 = memref.load %arg1[%c45] : memref<64xf32, #tpu.memory_space<smem>>
    %136 = vector.broadcast %135 : f32 to vector<1x512xf32>
    %137 = arith.mulf %136, %106 : vector<1x512xf32>
    %138 = arith.addf %134, %137 : vector<1x512xf32>
    %cst_14 = arith.constant 0.000000e+00 : f32
    %139 = vector.broadcast %cst_14 : f32 to vector<1x512xf32>
    %140 = arith.maximumf %138, %139 : vector<1x512xf32>
    %c34 = arith.constant 34 : index
    %141 = memref.load %arg1[%c34] : memref<64xf32, #tpu.memory_space<smem>>
    %142 = vector.broadcast %141 : f32 to vector<1x512xf32>
    %143 = arith.mulf %142, %67 : vector<1x512xf32>
    %c38 = arith.constant 38 : index
    %144 = memref.load %arg1[%c38] : memref<64xf32, #tpu.memory_space<smem>>
    %145 = vector.broadcast %144 : f32 to vector<1x512xf32>
    %146 = arith.mulf %145, %80 : vector<1x512xf32>
    %147 = arith.addf %143, %146 : vector<1x512xf32>
    %c42 = arith.constant 42 : index
    %148 = memref.load %arg1[%c42] : memref<64xf32, #tpu.memory_space<smem>>
    %149 = vector.broadcast %148 : f32 to vector<1x512xf32>
    %150 = arith.mulf %149, %93 : vector<1x512xf32>
    %151 = arith.addf %147, %150 : vector<1x512xf32>
    %c46 = arith.constant 46 : index
    %152 = memref.load %arg1[%c46] : memref<64xf32, #tpu.memory_space<smem>>
    %153 = vector.broadcast %152 : f32 to vector<1x512xf32>
    %154 = arith.mulf %153, %106 : vector<1x512xf32>
    %155 = arith.addf %151, %154 : vector<1x512xf32>
    %cst_15 = arith.constant 0.000000e+00 : f32
    %156 = vector.broadcast %cst_15 : f32 to vector<1x512xf32>
    %157 = arith.maximumf %155, %156 : vector<1x512xf32>
    %c48 = arith.constant 48 : index
    %158 = memref.load %arg1[%c48] : memref<64xf32, #tpu.memory_space<smem>>
    %159 = vector.broadcast %158 : f32 to vector<1x512xf32>
    %160 = arith.mulf %159, %123 : vector<1x512xf32>
    %c52 = arith.constant 52 : index
    %161 = memref.load %arg1[%c52] : memref<64xf32, #tpu.memory_space<smem>>
    %162 = vector.broadcast %161 : f32 to vector<1x512xf32>
    %163 = arith.mulf %162, %140 : vector<1x512xf32>
    %164 = arith.addf %160, %163 : vector<1x512xf32>
    %c56 = arith.constant 56 : index
    %165 = memref.load %arg1[%c56] : memref<64xf32, #tpu.memory_space<smem>>
    %166 = vector.broadcast %165 : f32 to vector<1x512xf32>
    %167 = arith.mulf %166, %157 : vector<1x512xf32>
    %168 = arith.addf %164, %167 : vector<1x512xf32>
    %c49 = arith.constant 49 : index
    %169 = memref.load %arg1[%c49] : memref<64xf32, #tpu.memory_space<smem>>
    %170 = vector.broadcast %169 : f32 to vector<1x512xf32>
    %171 = arith.mulf %170, %123 : vector<1x512xf32>
    %c53 = arith.constant 53 : index
    %172 = memref.load %arg1[%c53] : memref<64xf32, #tpu.memory_space<smem>>
    %173 = vector.broadcast %172 : f32 to vector<1x512xf32>
    %174 = arith.mulf %173, %140 : vector<1x512xf32>
    %175 = arith.addf %171, %174 : vector<1x512xf32>
    %c57 = arith.constant 57 : index
    %176 = memref.load %arg1[%c57] : memref<64xf32, #tpu.memory_space<smem>>
    %177 = vector.broadcast %176 : f32 to vector<1x512xf32>
    %178 = arith.mulf %177, %157 : vector<1x512xf32>
    %179 = arith.addf %175, %178 : vector<1x512xf32>
    %cst_16 = arith.constant 0.000000e+00 : f32
    %180 = vector.broadcast %cst_16 : f32 to vector<8x512xf32>
    %c0_17 = arith.constant 0 : index
    %c0_18 = arith.constant 0 : index
    %181 = vector.load %arg3[%c0_17, %c0_18] : memref<8x512xf32, #tpu.memory_space<vmem>>, vector<8x512xf32>
    tpu.vector_store %arg3[%c0_17, %c0_18], %180 {strides = array<i32>} : memref<8x512xf32, #tpu.memory_space<vmem>>, vector<8x512xf32>,
    %c0_19 = arith.constant 0 : index
    %c0_20 = arith.constant 0 : index
    %182 = vector.load %arg3[%c0_19, %c0_20] : memref<8x512xf32, #tpu.memory_space<vmem>>, vector<1x512xf32>
    tpu.vector_store %arg3[%c0_19, %c0_20], %168 {strides = array<i32>} : memref<8x512xf32, #tpu.memory_space<vmem>>, vector<1x512xf32>,
    %c1_21 = arith.constant 1 : index
    %c0_22 = arith.constant 0 : index
    %183 = vector.load %arg3[%c1_21, %c0_22] : memref<8x512xf32, #tpu.memory_space<vmem>>, vector<1x512xf32>
    tpu.vector_store %arg3[%c1_21, %c0_22], %179 {strides = array<i32>} : memref<8x512xf32, #tpu.memory_space<vmem>>, vector<1x512xf32>,
    return
  }
  func.func @transform_0(%arg0: i32) -> i32 {
    %c0_i32 = arith.constant 0 : i32
    %c0_i32_0 = arith.constant 0 : i32
    return %c0_i32 : i32
  }
  func.func @transform_1(%arg0: i32) -> (i32, i32) {
    %c0_i32 = arith.constant 0 : i32
    %c0_i32_0 = arith.constant 0 : i32
    return %c0_i32, %arg0 : i32, i32
  }
  func.func @transform_2(%arg0: i32) -> (i32, i32) {
    %c0_i32 = arith.constant 0 : i32
    %c0_i32_0 = arith.constant 0 : i32
    return %c0_i32, %arg0 : i32, i32
  }
}

</mosaic_0001>

<bundles_post_ra>
// kernel: simplenet_forward.1
= control target key start
LH: loop header
LB: loop body
LE: loop exit
PB: predicated region body
PF: predicated region fallthrough
CT: control target
= control target key end

     0   :  { %7 = vsyncpa [#allocation3], 0  ;;  %s347_s0 = inlined_call_operand.vmem [shape: f32[64], index: 0, kind: input, shape index: {}]   ;;  %s348_s1 = inlined_call_operand.vmem [shape: f32[8,512], index: 1, kind: input, shape index: {}]   ;;  %s349_s2 = inlined_call_operand.vmem [shape: f32[8,512], index: 2, kind: output, shape index: {}]  }
   0x1   :  { %s14_s11 = sshll.u32 %s347_s0, 4  ;;  %s15_s11 = int_to_ptr.vmem [resolvable:$true] %s14_s11 }
   0x2   :  { %s262_s12 = scalar_lea.vmem %s15_s11, 16  ;;  %p267_p1 = scmp.lt.s32.totalorder %s15_s11, %s15_s11 }
   0x3   :  { %p263_p0 = scmp.ne.s32.totalorder %s15_s11, %s262_s12  ;;  %p268_p2 = scmp.lt.s32.totalorder %s262_s12, %s262_s12 }
   0x5   :  { %p269_p3 = por %p268_p2, %p267_p1 }
   0x7   :  { %p270_p4 = pnand %p269_p3, %p263_p0 }
   0x9   :  { %273 = shalt.err (!%p270_p4)
}
   0xa   :  { %s276_s13 = smov [#allocation2]  }
   0xb   :  { %17 = dma.vmem_to_smem %s15_s11, 16, %s276_s13, [#allocation3]  }
   0xc   :  { %274 = dma.done.wait [#allocation3], 16  }
   0xd   :  { %275 = vsyncadd [#allocation3], 4294967280 }
   0xe   :  { %23 = sfence }
   0xf   :  { %s31_s14 = sld [smem:[#allocation2]]  ;;  %v277_v0 = vmov 0.0   ;;  %v24_v1 = vld [vmem:[%s348_s1] ss:$8 sm:$0xf] }
  0x10   :  { %197 = vst [vmem:[%s349_s2] sm:$0xff] %v277_v0  ;;  %198 = vst [vmem:[%s349_s2 + $0x8] sm:$0xff] %v277_v0  ;;  %s218_s22 = sld [smem:[#allocation2 + $0x4]]  ;;  %v215_v2 = vld [vmem:[%s348_s1 + $0x1] ss:$8 sm:$0xf] }
  0x11   :  { %199 = vst [vmem:[%s349_s2 + $0x10] sm:$0xff] %v277_v0  ;;  %200 = vst [vmem:[%s349_s2 + $0x18] sm:$0xff] %v277_v0  ;;  %s219_s23 = sld [smem:[#allocation2 + $0x8]]  ;;  %v216_v4 = vld [vmem:[%s348_s1 + $0x2] ss:$8 sm:$0xf] }
  0x12   :  { %s220_s26 = sld [smem:[#allocation2 + $0xc]]  ;;  %v217_v6 = vld [vmem:[%s348_s1 + $0x3] ss:$8 sm:$0xf] }
  0x13   :  { %s221_s27 = sld [smem:[#allocation2 + $0x1]] }
  0x14   :  { %s222_s30 = sld [smem:[#allocation2 + $0x5]] }
  0x15   :  { %v32_v3 = vstv %s31_s14  ;;  %s223_s5 = sld [smem:[#allocation2 + $0x9]] }
  0x16   :  { %v33_v5 = vmul.f32 %v32_v3, %v24_v1  ;;  %v35_v7 = vstv %s218_s22  ;;  %s224_s8 = sld [smem:[#allocation2 + $0xd]] }
  0x17   :  { %v36_v8 = vmul.f32 %v215_v2, %v35_v7  ;;  %v39_v9 = vstv %s219_s23  ;;  %s225_s9 = sld [smem:[#allocation2 + $0x2]] }
  0x18   :  { %v40_v10 = vmul.f32 %v216_v4, %v39_v9  ;;  %v43_v11 = vstv %s220_s26  ;;  %s226_s10 = sld [smem:[#allocation2 + $0x6]] }
  0x19   :  { %v37_v12 = vadd.f32 %v36_v8, %v33_v5  ;;  %v44_v13 = vmul.f32 %v217_v6, %v43_v11  ;;  %v48_v14 = vstv %s221_s27  ;;  %s227_s11 = sld [smem:[#allocation2 + $0xa]] }
  0x1a   :  { %v49_v15 = vmul.f32 %v48_v14, %v24_v1  ;;  %v51_v16 = vstv %s222_s30  ;;  %s228_s12 = sld [smem:[#allocation2 + $0xe]] }
  0x1b   :  { %v41_v17 = vadd.f32 %v40_v10, %v37_v12  ;;  %v52_v18 = vmul.f32 %v215_v2, %v51_v16  ;;  %v55_v19 = vstv %s223_s5  ;;  %s229_s13 = sld [smem:[#allocation2 + $0x10]] }
  0x1c   :  { %v56_v20 = vmul.f32 %v216_v4, %v55_v19  ;;  %v59_v21 = vstv %s224_s8  ;;  %s320_s1 = sld [smem:[#allocation2 + $0x14]] }
  0x1d   :  { %v45_v22 = vadd.f32 %v44_v13, %v41_v17  ;;  %v53_v23 = vadd.f32 %v52_v18, %v49_v15  ;;  %v60_v24 = vmul.f32 %v217_v6, %v59_v21  ;;  %v64_v25 = vstv %s225_s9  ;;  %s322_s14 = sld [smem:[#allocation2 + $0x18]] }
  0x1e   :  { %v65_v26 = vmul.f32 %v64_v25, %v24_v1  ;;  %v67_v27 = vstv %s226_s10  ;;  %s232_s15 = sld [smem:[#allocation2 + $0x11]] }
  0x1f   :  { %v46_v28 = vmax.f32 %v45_v22, 0.0  ;;  %v57_v29 = vadd.f32 %v56_v20, %v53_v23  ;;  %v68_v30 = vmul.f32 %v215_v2, %v67_v27  ;;  %v71_v31 = vstv %s227_s11  ;;  %s233_s16 = sld [smem:[#allocation2 + $0x15]] }
  0x20   :  { %v72_v32 = vmul.f32 %v216_v4, %v71_v31  ;;  %v75_v33 = vstv %s228_s12  ;;  %s324_s0 = sld [smem:[#allocation2 + $0x19]] }
  0x21   :  { %v61_v34 = vadd.f32 %v60_v24, %v57_v29  ;;  %v69_v35 = vadd.f32 %v68_v30, %v65_v26  ;;  %v76_v36 = vmul.f32 %v217_v6, %v75_v33  ;;  %v80_v37 = vstv %s229_s13  ;;  %s235_s17 = sld [smem:[#allocation2 + $0x12]] }
  0x22   :  { %v83_v38 = vstv %s320_s1  ;;  %s236_s18 = sld [smem:[#allocation2 + $0x16]]  ;;  %v81_v41 = vmul.f32 %v80_v37, %v46_v28 }
  0x23   :  { %v62_v39 = vmax.f32 %v61_v34, 0.0  ;;  %v73_v40 = vadd.f32 %v72_v32, %v69_v35  ;;  %s237_s19 = sld [smem:[#allocation2 + $0x1a]]  ;;  %v87_v47 = vstv %s322_s14 }
  0x24   :  { %v92_v42 = vstv %s232_s15  ;;  %s238_s20 = sld [smem:[#allocation2 + $0x13]] }
  0x25   :  { %v77_v43 = vadd.f32 %v76_v36, %v73_v40  ;;  %v84_v44 = vmul.f32 %v83_v38, %v62_v39  ;;  %v93_v45 = vmul.f32 %v92_v42, %v46_v28  ;;  %v95_v46 = vstv %s233_s16  ;;  %s327_s21 = sld [smem:[#allocation2 + $0x17]] }
  0x26   :  { %v96_v48 = vmul.f32 %v95_v46, %v62_v39  ;;  %v99_v49 = vstv %s324_s0  ;;  %s240_s22 = sld [smem:[#allocation2 + $0x1b]] }
  0x27   :  { %v78_v50 = vmax.f32 %v77_v43, 0.0  ;;  %v85_v51 = vadd.f32 %v84_v44, %v81_v41  ;;  %v104_v52 = vstv %s235_s17  ;;  %s331_s23 = sld [smem:[#allocation2 + $0x20]] }
  0x28   :  { %v97_v53 = vadd.f32 %v96_v48, %v93_v45  ;;  %v105_v54 = vmul.f32 %v104_v52, %v46_v28  ;;  %v107_v55 = vstv %s236_s18  ;;  %s242_s24 = sld [smem:[#allocation2 + $0x24]] }
  0x29   :  { %v88_v56 = vmul.f32 %v87_v47, %v78_v50  ;;  %v100_v57 = vmul.f32 %v99_v49, %v78_v50  ;;  %v108_v58 = vmul.f32 %v107_v55, %v62_v39  ;;  %v111_v59 = vstv %s237_s19  ;;  %s243_s25 = sld [smem:[#allocation2 + $0x28]] }
  0x2a   :  { %v112_v60 = vmul.f32 %v111_v59, %v78_v50  ;;  %v116_v61 = vstv %s238_s20  ;;  %s333_s26 = sld [smem:[#allocation2 + $0x2c]] }
  0x2b   :  { %v89_v62 = vadd.f32 %v88_v56, %v85_v51  ;;  %v101_v63 = vadd.f32 %v100_v57, %v97_v53  ;;  %v109_v0 = vadd.f32 %v108_v58, %v105_v54  ;;  %v117_v1 = vmul.f32 %v116_v61, %v46_v28  ;;  %s245_s27 = sld [smem:[#allocation2 + $0x21]] }
  0x2c   :  { %v119_v2 = vstv %s327_s21  ;;  %v123_v3 = vstv %s240_s22  ;;  %s246_s28 = sld [smem:[#allocation2 + $0x25]]  ;;  %v201_v56 = vlaneseq }
  0x2d   :  { %v90_v4 = vmax.f32 %v89_v62, 0.0  ;;  %v102_v5 = vmax.f32 %v101_v63, 0.0  ;;  %v113_v6 = vadd.f32 %v112_v60, %v109_v0  ;;  %v120_v7 = vmul.f32 %v119_v2, %v62_v39  ;;  %s247_s29 = sld [smem:[#allocation2 + $0x29]] }
  0x2e   :  { %v124_v8 = vmul.f32 %v123_v3, %v78_v50  ;;  %v128_v9 = vstv %s331_s23  ;;  %v131_v10 = vstv %s242_s24  ;;  %s248_s30 = sld [smem:[#allocation2 + $0x2d]]  ;;  %vm203_vm0 = vcmp.lt.s32.totalorder %v201_v56, 512 }
  0x2f   :  { %v114_v11 = vmax.f32 %v113_v6, 0.0  ;;  %v121_v12 = vadd.f32 %v120_v7, %v117_v1  ;;  %v129_v13 = vmul.f32 %v128_v9, %v90_v4  ;;  %v132_v14 = vmul.f32 %v131_v10, %v102_v5  ;;  %s249_s3 = sld [smem:[#allocation2 + $0x22]] }
  0x30   :  { %v135_v15 = vstv %s243_s25  ;;  %s250_s4 = sld [smem:[#allocation2 + $0x26]]  ;;  %v139_v20 = vstv %s333_s26 }
  0x31   :  { %v125_v16 = vadd.f32 %v124_v8, %v121_v12  ;;  %v133_v17 = vadd.f32 %v132_v14, %v129_v13  ;;  %v136_v18 = vmul.f32 %v135_v15, %v114_v11  ;;  %v144_v19 = vstv %s245_s27  ;;  %s251_s5 = sld [smem:[#allocation2 + $0x2a]] }
  0x32   :  { %v145_v21 = vmul.f32 %v144_v19, %v90_v4  ;;  %v147_v22 = vstv %s246_s28  ;;  %s252_s6 = sld [smem:[#allocation2 + $0x2e]] }
  0x33   :  { %v126_v23 = vmax.f32 %v125_v16, 0.0  ;;  %v137_v24 = vadd.f32 %v136_v18, %v133_v17  ;;  %v148_v25 = vmul.f32 %v147_v22, %v102_v5  ;;  %v151_v26 = vstv %s247_s29  ;;  %s253_s7 = sld [smem:[#allocation2 + $0x30]] }
  0x34   :  { %v152_v27 = vmul.f32 %v151_v26, %v114_v11  ;;  %v155_v28 = vstv %s248_s30  ;;  %s254_s8 = sld [smem:[#allocation2 + $0x34]] }
  0x35   :  { %v140_v29 = vmul.f32 %v139_v20, %v126_v23  ;;  %v149_v30 = vadd.f32 %v148_v25, %v145_v21  ;;  %v156_v31 = vmul.f32 %v155_v28, %v126_v23  ;;  %v160_v32 = vstv %s249_s3  ;;  %s338_s9 = sld [smem:[#allocation2 + $0x38]] }
  0x36   :  { %v161_v33 = vmul.f32 %v160_v32, %v90_v4  ;;  %v163_v34 = vstv %s250_s4  ;;  %s256_s10 = sld [smem:[#allocation2 + $0x31]] }
  0x37   :  { %v141_v35 = vadd.f32 %v140_v29, %v137_v24  ;;  %v153_v36 = vadd.f32 %v152_v27, %v149_v30  ;;  %v164_v37 = vmul.f32 %v163_v34, %v102_v5  ;;  %v167_v38 = vstv %s251_s5  ;;  %s257_s11 = sld [smem:[#allocation2 + $0x35]] }
  0x38   :  { %v168_v39 = vmul.f32 %v167_v38, %v114_v11  ;;  %v171_v40 = vstv %s252_s6  ;;  %s258_s12 = sld [smem:[#allocation2 + $0x39]] }
  0x39   :  { %v142_v41 = vmax.f32 %v141_v35, 0.0  ;;  %v157_v42 = vadd.f32 %v156_v31, %v153_v36  ;;  %v165_v43 = vadd.f32 %v164_v37, %v161_v33  ;;  %v172_v44 = vmul.f32 %v171_v40, %v126_v23 }
  0x3a   :  { %v176_v45 = vstv %s253_s7  ;;  %v179_v46 = vstv %s254_s8 }
  0x3b   :  { %v158_v47 = vmax.f32 %v157_v42, 0.0  ;;  %v169_v48 = vadd.f32 %v168_v39, %v165_v43  ;;  %v177_v49 = vmul.f32 %v176_v45, %v142_v41  ;;  %v183_v55 = vstv %s338_s9 }
  0x3c   :  { %v187_v50 = vstv %s256_s10 }
  0x3d   :  { %v173_v51 = vadd.f32 %v172_v44, %v169_v48  ;;  %v180_v52 = vmul.f32 %v179_v46, %v158_v47  ;;  %v188_v53 = vmul.f32 %v187_v50, %v142_v41  ;;  %v190_v54 = vstv %s257_s11 }
  0x3e   :  { %v191_v57 = vmul.f32 %v190_v54, %v158_v47  ;;  %v194_v58 = vstv %s258_s12 }
  0x3f   :  { %v174_v59 = vmax.f32 %v173_v51, 0.0  ;;  %v181_v60 = vadd.f32 %v180_v52, %v177_v49 }
  0x40   :  { %v192_v61 = vadd.f32 %v191_v57, %v188_v53 }
  0x41   :  { %v184_v62 = vmul.f32 %v183_v55, %v174_v59  ;;  %v195_v63 = vmul.f32 %v194_v58, %v174_v59 }
  0x43   :  { %v185_v0 = vadd.f32 %v184_v62, %v181_v60  ;;  %v196_v1 = vadd.f32 %v195_v63, %v192_v61 }
  0x45   :  { %205 = vst.msk [vmem:[%s349_s2] ss:$8 sm:$0xf] %vm203_vm0, %v185_v0  ;;  %259 = vst.msk [vmem:[%s349_s2 + $0x1] ss:$8 sm:$0xf] %vm203_vm0, %v196_v1 }
  0x46   :  { %214 = vsyncpa [#allocation3], 1 }

</bundles_post_ra>
